<compile_context>
chip_gen: v5e
topology: v5e:2x2
jax: 0.10.0
libtpu: 0.0.40
codegen_flags: <defaults>
</compile_context>

<pallas_src>
import numpy as np
import jax
import jax.numpy as jnp
from jax.experimental import pallas as pl
from jax.experimental.pallas import tpu as pltpu


def _simple_ssm_kernel(x_ref, w1_ref, b1_ref, w2_ref, b2_ref, out_ref):
    # x_ref  : (TILE_N, D_in)   f32
    # w1_ref : (D_in, H)        f32   (resident across grid)
    # b1_ref : (1, H)           f32   (resident)
    # w2_ref : (H, D_out)       f32   (resident)
    # b2_ref : (1, D_out)       f32   (resident)
    # out_ref: (TILE_N, D_out)  f32
    x = x_ref[...]

    # Linear1 + SiLU, fully fused in VMEM.
    h = jnp.dot(x, w1_ref[...], preferred_element_type=jnp.float32) + b1_ref[...]
    h = h * jax.nn.sigmoid(h)  # SiLU: sigmoid goes to the EUP slot, mul to VPU.

    # TODO(synk): nn.Dropout(0.1) is identity in eval mode; training-mode dropout
    # would use pltpu.prng_seed + pltpu.stateful_bernoulli per tile.

    # Linear2.
    y = jnp.dot(h, w2_ref[...], preferred_element_type=jnp.float32) + b2_ref[...]
    out_ref[...] = y.astype(out_ref.dtype)


def simple_ssm_forward(x, w1, b1, w2, b2, *, tile_n=256):
    """Fused SimpleSSM forward.

    x : (..., D_in) f32
    w1: (D_in, H)   f32     b1: (H,) f32
    w2: (H, D_out)  f32     b2: (D_out,) f32
    returns (..., D_out) f32
    """
    lead_shape = x.shape[:-1]
    d_in = x.shape[-1]
    h = w1.shape[1]
    d_out = w2.shape[1]

    x2 = x.reshape(-1, d_in).astype(jnp.float32)
    n = x2.shape[0]

    # Pick a sublane-aligned row tile; pad N up so the grid divides evenly.
    tile = min(tile_n, max(8, n))
    tile = max(8, (tile // 8) * 8)
    n_pad = pl.cdiv(n, tile) * tile
    if n_pad != n:
        x2 = jnp.pad(x2, ((0, n_pad - n), (0, 0)))

    b1_2d = b1.reshape(1, h).astype(jnp.float32)
    b2_2d = b2.reshape(1, d_out).astype(jnp.float32)
    w1_f = w1.astype(jnp.float32)
    w2_f = w2.astype(jnp.float32)

    grid = (n_pad // tile,)

    out = pl.pallas_call(
        _simple_ssm_kernel,
        out_shape=jax.ShapeDtypeStruct((n_pad, d_out), jnp.float32),
        grid_spec=pltpu.PrefetchScalarGridSpec(
            num_scalar_prefetch=0,
            grid=grid,
            in_specs=[
                pl.BlockSpec((tile, d_in), lambda i: (i, 0)),   # x tile (pipelined)
                pl.BlockSpec((d_in, h), lambda i: (0, 0)),      # W1 (resident)
                pl.BlockSpec((1, h), lambda i: (0, 0)),         # b1 (resident)
                pl.BlockSpec((h, d_out), lambda i: (0, 0)),     # W2 (resident)
                pl.BlockSpec((1, d_out), lambda i: (0, 0)),     # b2 (resident)
            ],
            out_specs=pl.BlockSpec((tile, d_out), lambda i: (i, 0)),
        ),
        compiler_params=pltpu.CompilerParams(
            dimension_semantics=("parallel",),   # megacore-shardable on v7x
        ),
    )(x2, w1_f, b1_2d, w2_f, b2_2d)

    if n_pad != n:
        out = out[:n]
    return out.reshape(*lead_shape, d_out)


def _reference(x, w1, b1, w2, b2):
    """Pure-JAX re-implementation of the PyTorch forward (eval mode)."""
    h = x @ w1 + b1
    h = h * jax.nn.sigmoid(h)
    return h @ w2 + b2


if __name__ == "__main__":
    key = jax.random.PRNGKey(0)
    k1, k2, k3, k4, k5 = jax.random.split(key, 5)

    # Small deterministic shapes: batch=2, seq=8, input_dim=32, hidden=256, output_dim=32.
    batch, seq, d_in, hidden, d_out = 2, 8, 32, 256, 32

    x = jax.random.normal(k1, (batch, seq, d_in), dtype=jnp.float32)
    w1 = jax.random.normal(k2, (d_in, hidden), dtype=jnp.float32) * (1.0 / np.sqrt(d_in))
    b1 = jax.random.normal(k3, (hidden,), dtype=jnp.float32) * 0.01
    w2 = jax.random.normal(k4, (hidden, d_out), dtype=jnp.float32) * (1.0 / np.sqrt(hidden))
    b2 = jax.random.normal(k5, (d_out,), dtype=jnp.float32) * 0.01

    # Use a small row tile so the tiny test still exercises a multi-step grid.
    out = simple_ssm_forward(x, w1, b1, w2, b2, tile_n=8)
    out = jax.block_until_ready(out)

    ref = _reference(x.reshape(-1, d_in), w1, b1, w2, b2).reshape(batch, seq, d_out)
    np.testing.assert_allclose(np.asarray(out), np.asarray(ref), rtol=1e-5, atol=1e-5)

    print("KERNEL_OK")
</pallas_src>

<mosaic_0001>
module attributes {stable_mosaic.version = 11 : i64} {
  func.func @_simple_ssm_kernel(%arg0: i32, %arg1: memref<8x32xf32, #tpu.memory_space<vmem>>, %arg2: memref<32x256xf32, #tpu.memory_space<vmem>>, %arg3: memref<1x256xf32, #tpu.memory_space<vmem>>, %arg4: memref<256x32xf32, #tpu.memory_space<vmem>>, %arg5: memref<1x32xf32, #tpu.memory_space<vmem>>, %arg6: memref<8x32xf32, #tpu.memory_space<vmem>>) attributes {dimension_semantics = [#tpu.dimension_semantics<parallel>], iteration_bounds = array<i64: 2>, scalar_prefetch = 0 : i64, scratch_operands = 0 : i64, tpu.core_type = #tpu.core_type<tc>, window_params = [{transform_indices = @transform_0, window_bounds = array<i64: 8, 32>}, {pipeline_mode = #tpu.pipeline_mode<synchronous>, transform_indices = @transform_1, window_bounds = array<i64: 32, 256>}, {pipeline_mode = #tpu.pipeline_mode<synchronous>, transform_indices = @transform_2, window_bounds = array<i64: 1, 256>}, {pipeline_mode = #tpu.pipeline_mode<synchronous>, transform_indices = @transform_3, window_bounds = array<i64: 256, 32>}, {pipeline_mode = #tpu.pipeline_mode<synchronous>, transform_indices = @transform_4, window_bounds = array<i64: 1, 32>}, {transform_indices = @transform_5, window_bounds = array<i64: 8, 32>}]} {
    %c0 = arith.constant 0 : index
    %c0_0 = arith.constant 0 : index
    %0 = vector.load %arg1[%c0, %c0_0] : memref<8x32xf32, #tpu.memory_space<vmem>>, vector<8x32xf32>
    %c0_1 = arith.constant 0 : index
    %c0_2 = arith.constant 0 : index
    %1 = vector.load %arg2[%c0_1, %c0_2] : memref<32x256xf32, #tpu.memory_space<vmem>>, vector<32x256xf32>
    %cst = arith.constant dense<0.000000e+00> : vector<8x256xf32>
    %2 = tpu.matmul %0, %1, %cst {dimension_numbers = #tpu.dot_dimension_numbers<[1], [0], [0], [1], [0, 0, 1, 1], [], []>} : vector<8x32xf32>, vector<32x256xf32>, vector<8x256xf32> -> vector<8x256xf32>
    %c0_3 = arith.constant 0 : index
    %c0_4 = arith.constant 0 : index
    %3 = vector.load %arg3[%c0_3, %c0_4] : memref<1x256xf32, #tpu.memory_space<vmem>>, vector<1x256xf32>
    %4 = vector.broadcast %3 : vector<1x256xf32> to vector<8x256xf32>
    %5 = arith.addf %2, %4 : vector<8x256xf32>
    %6 = arith.negf %5 : vector<8x256xf32>
    %7 = math.exp %6 : vector<8x256xf32>
    %cst_5 = arith.constant 1.000000e+00 : f32
    %8 = vector.broadcast %cst_5 : f32 to vector<8x256xf32>
    %9 = arith.addf %8, %7 : vector<8x256xf32>
    %10 = arith.divf %8, %9 : vector<8x256xf32>
    %11 = arith.mulf %5, %10 : vector<8x256xf32>
    %c0_6 = arith.constant 0 : index
    %c0_7 = arith.constant 0 : index
    %12 = vector.load %arg4[%c0_6, %c0_7] : memref<256x32xf32, #tpu.memory_space<vmem>>, vector<256x32xf32>
    %cst_8 = arith.constant dense<0.000000e+00> : vector<8x32xf32>
    %13 = tpu.matmul %11, %12, %cst_8 {dimension_numbers = #tpu.dot_dimension_numbers<[1], [0], [0], [1], [0, 0, 1, 1], [], []>} : vector<8x256xf32>, vector<256x32xf32>, vector<8x32xf32> -> vector<8x32xf32>
    %c0_9 = arith.constant 0 : index
    %c0_10 = arith.constant 0 : index
    %14 = vector.load %arg5[%c0_9, %c0_10] : memref<1x32xf32, #tpu.memory_space<vmem>>, vector<1x32xf32>
    %15 = vector.broadcast %14 : vector<1x32xf32> to vector<8x32xf32>
    %16 = arith.addf %13, %15 : vector<8x32xf32>
    %c0_11 = arith.constant 0 : index
    %c0_12 = arith.constant 0 : index
    %17 = vector.load %arg6[%c0_11, %c0_12] : memref<8x32xf32, #tpu.memory_space<vmem>>, vector<8x32xf32>
    tpu.vector_store %arg6[%c0_11, %c0_12], %16 {strides = array<i32>} : memref<8x32xf32, #tpu.memory_space<vmem>>, vector<8x32xf32>,
    return
  }
  func.func @transform_0(%arg0: i32) -> (i32, i32) {
    %c0_i32 = arith.constant 0 : i32
    %c0_i32_0 = arith.constant 0 : i32
    return %arg0, %c0_i32 : i32, i32
  }
  func.func @transform_1(%arg0: i32) -> (i32, i32) {
    %c0_i32 = arith.constant 0 : i32
    %c0_i32_0 = arith.constant 0 : i32
    %c0_i32_1 = arith.constant 0 : i32
    return %c0_i32, %c0_i32_0 : i32, i32
  }
  func.func @transform_2(%arg0: i32) -> (i32, i32) {
    %c0_i32 = arith.constant 0 : i32
    %c0_i32_0 = arith.constant 0 : i32
    %c0_i32_1 = arith.constant 0 : i32
    return %c0_i32, %c0_i32_0 : i32, i32
  }
  func.func @transform_3(%arg0: i32) -> (i32, i32) {
    %c0_i32 = arith.constant 0 : i32
    %c0_i32_0 = arith.constant 0 : i32
    %c0_i32_1 = arith.constant 0 : i32
    return %c0_i32, %c0_i32_0 : i32, i32
  }
  func.func @transform_4(%arg0: i32) -> (i32, i32) {
    %c0_i32 = arith.constant 0 : i32
    %c0_i32_0 = arith.constant 0 : i32
    %c0_i32_1 = arith.constant 0 : i32
    return %c0_i32, %c0_i32_0 : i32, i32
  }
  func.func @transform_5(%arg0: i32) -> (i32, i32) {
    %c0_i32 = arith.constant 0 : i32
    %c0_i32_0 = arith.constant 0 : i32
    return %arg0, %c0_i32 : i32, i32
  }
}

</mosaic_0001>

<bundles_post_ra>
// kernel: tpu_custom_call.1
= control target key start
LH: loop header
LB: loop body
LE: loop exit
PB: predicated region body
PF: predicated region fallthrough
CT: control target
= control target key end

     0   :  { %10 = vsyncpa [#allocation3], 0  ;;  %s841_s0 = inlined_call_operand.vmem [shape: f32[16,32], index: 0, kind: input, shape index: {}]   ;;  %s842_s1 = inlined_call_operand.vmem [shape: f32[32,256], index: 1, kind: input, shape index: {}]   ;;  %s843_s2 = inlined_call_operand.vmem [shape: f32[1,256], index: 2, kind: input, shape index: {}]   ;;  %s844_s3 = inlined_call_operand.vmem [shape: f32[256,32], index: 3, kind: input, shape index: {}]   ;;  %s845_s4 = inlined_call_operand.vmem [shape: f32[1,32], index: 4, kind: input, shape index: {}]   ;;  %s846_s5 = inlined_call_operand.hbm [shape: f32[16,32], index: 5, kind: output, shape index: {}]  }
   0x1   :  { %12 = vsyncpa [#allocation3 + $0x1], 0  ;;  %s627_s18 = smov 0   ;;  %s629_s19 = smov 0  }
   0x2   :  { %s631_s20 = smov 0   ;;  %s633_s21 = smov 0  }
   0x3 LB: > { %s648_s22 = sadd.s32 4294967295, %s595_s21   ;;  %s471_s23 = sadd.s32 4294967294, %s595_s21   ;;  %s595_s21 = sphi %s633_s21, %s852_s21   ;;  %s591_s20 = sphi %s631_s20, %s851_s20   ;;  %s587_s19 = sphi %s629_s19, %s850_s19   ;;  %s583_s18 = sphi %s627_s18, %s849_s18  }
   0x4   : > { %s652_s24 = sadd.s32 1, %s595_s21   ;;  %s135_s25 = sadd.s32 1, %s591_s20 }
   0x5   : > { %s132_s26 = ssub.s32 %s595_s21, %s652_s24  ;;  %p145_p0 = scmp.ne.s32.totalorder %s591_s20, %s587_s19 }
   0x6   : > { %p133_p1 = scmp.eq.s32.totalorder %s132_s26, 0  ;;  %p146_p2 = scmp.eq.s32.totalorder %s648_s22, 1 }
   0x7   : > { %p151_p3 = scmp.ne.s32.totalorder %s587_s19, %s583_s18  ;;  %p152_p4 = scmp.eq.s32.totalorder %s471_s23, 1 }
   0x8   : > { %s663_s27 = scalar_select %p133_p1, %s591_s20, %s135_s25  }
   0x9   : > { %p665_p5 = por %p146_p2, %p145_p0  ;;  %p669_p6 = por %p152_p4, %p151_p3 }
   0xa   : > { %p474_p7 = scmp.ge.s32.totalorder %s595_s21, 1  ;;  %p189_p8 = scmp.lt.s32.totalorder %s595_s21, 3 }
   0xc   : > { %p190_p9 = pnand %p474_p7, %p189_p8 }
   0xd   : > { %p216_p10 = scmp.lt.s32.totalorder (!%p190_p9), %s648_s22, 1  ;;  %s213_s12 = sand.u32 (!%p190_p9), 1, %s587_s19  }
   0xe   : > { %193 = sbr.rel (%p190_p9) target bundleno = 324 (0x144), region = 40  ;;  %s475_s13 = sshll.u32 (!%p190_p9), %s213_s12, 3 }
   0xf   : > { %s482_s14 = sshll.u32 (!%p190_p9), %s648_s22, 3  ;;  %s215_s26 = scalar_lea.vmem (!%p190_p9), [#allocation2], %s475_s13 }
  0x10   : > { %s407_s25 = scalar_lea.hbm (!%p190_p9), %s846_s5, %s482_s14  ;;  %s409_s30 = sshll.u32 (!%p190_p9), %s215_s26, 4  ;;  %s410_s30 = int_to_ptr.vmem [resolvable:$true] %s409_s30 }
  0x11   : > { %s553_s11 = scalar_lea.hbm (!%p190_p9), %s846_s5, 16 }
  0x13   : > { %v227_v0 = vld [vmem:[%s842_s1 + $0x30] sm:$0xff]  ;;  %v228_v1 = vld [vmem:[%s842_s1 + $0x38] sm:$0xff]  ;;  %v225_v2 = vld [vmem:[%s842_s1 + $0x20] sm:$0xff]  ;;  %s217_s17 = scalar_select %p216_p10, %s648_s22, 1  ;;  %vm235_vm0 = vcmask 261120  }
  0x14   : > { %251 = vmatpush.msra.mxu0 %v227_v0  ;;  %271 = vmatpush.msra.mxu1 %v228_v1  ;;  %v226_v3 = vld [vmem:[%s842_s1 + $0x28] sm:$0xff]  ;;  %v223_v4 = vld [vmem:[%s842_s1 + $0x10] sm:$0xff]  ;;  %v224_v5 = vld [vmem:[%s842_s1 + $0x18] sm:$0xff]  ;;  %s397_s22 = scalar_lea.sflag [#allocation3], %s213_s12 }
  0x15   : > { %v221_v6 = vld [vmem:[%s842_s1] sm:$0xff]  ;;  %v222_v7 = vld [vmem:[%s842_s1 + $0x8] sm:$0xff]  ;;  %s476_s6 = sshll.u32 %s217_s17, 3  ;;  %v334_v9 = vld [vmem:[%s844_s3 + $0x78] sm:$0xff] }
  0x16   : > { %252 = vmatpush.msra.mxu0 %v225_v2  ;;  %272 = vmatpush.msra.mxu1 %v226_v3  ;;  %s219_s9 = scalar_lea.vmem %s841_s0, %s476_s6  ;;  %v350_v10 = vld [vmem:[%s844_s3 + $0xf8] sm:$0xff]  ;;  %v333_v11 = vld [vmem:[%s844_s3 + $0x70] sm:$0xff]  ;;  %v332_v13 = vld [vmem:[%s844_s3 + $0x68] sm:$0xff]  ;;  %s411_s6 = sshll.u32 %s407_s25, 4  ;;  %s412_s6 = int_to_ptr.hbm [resolvable:$true] %s411_s6 }
  0x17   : > { %v220_v8 = vld [vmem:[%s219_s9] sm:$0xff]  ;;  %355 = vmatpush.msra.mxu2 %v334_v9  ;;  %375 = vmatpush.msra.mxu3 %v350_v10  ;;  %v349_v12 = vld [vmem:[%s844_s3 + $0xf0] sm:$0xff]  ;;  %v348_v14 = vld [vmem:[%s844_s3 + $0xe8] sm:$0xff]  ;;  %s547_s7 = sshra.s32 %s412_s6, 4  ;;  %s548_s7 = int_to_ptr.hbm [resolvable:$true] %s547_s7 }
  0x18   : > { %253 = vmatpush.msra.mxu0 %v223_v4  ;;  %273 = vmatpush.msra.mxu1 %v224_v5  ;;  %v331_v15 = vld [vmem:[%s844_s3 + $0x60] sm:$0xff]  ;;  %v330_v17 = vld [vmem:[%s844_s3 + $0x58] sm:$0xff]  ;;  %v329_v19 = vld [vmem:[%s844_s3 + $0x50] sm:$0xff]  ;;  %s549_s8 = scalar_lea.hbm %s548_s7, 8  ;;  %p554_p0 = scmp.lt.s32.totalorder %s548_s7, %s846_s5 }
  0x19   : > { %356 = vmatpush.msra.mxu2 %v333_v11  ;;  %376 = vmatpush.msra.mxu3 %v349_v12  ;;  %v347_v16 = vld [vmem:[%s844_s3 + $0xe0] sm:$0xff]  ;;  %v346_v18 = vld [vmem:[%s844_s3 + $0xd8] sm:$0xff]  ;;  %v345_v20 = vld [vmem:[%s844_s3 + $0xd0] sm:$0xff]  ;;  %p550_p11 = scmp.ne.s32.totalorder %s548_s7, %s549_s8  ;;  %p555_p1 = scmp.lt.s32.totalorder %s553_s11, %s549_s8 }
  0x1a   : > { %254 = vmatpush.msra.mxu0 %v221_v6  ;;  %274 = vmatpush.msra.mxu1 %v222_v7  ;;  %v328_v21 = vld [vmem:[%s844_s3 + $0x48] sm:$0xff]  ;;  %v327_v23 = vld [vmem:[%s844_s3 + $0x40] sm:$0xff]  ;;  %v326_v25 = vld [vmem:[%s844_s3 + $0x38] sm:$0xff] }
  0x1b   : > { %477 = vmatmul.msk.f32.vlgmr.msra.gmra.mxu0 %vm235_vm0, %v220_v8  ;;  %478 = vmatmul.msk.f32.vlgmr.msra.gmra.mxu1 %vm235_vm0, %v220_v8  ;;  %v344_v22 = vld [vmem:[%s844_s3 + $0xc8] sm:$0xff]  ;;  %v343_v24 = vld [vmem:[%s844_s3 + $0xc0] sm:$0xff]  ;;  %v342_v26 = vld [vmem:[%s844_s3 + $0xb8] sm:$0xff]  ;;  %p551_p12 = pnand %p550_p11, %p665_p5  ;;  %p556_p2 = por %p555_p1, %p554_p0 }
  0x1c   : > { %357 = vmatpush.msra.mxu2 %v332_v13  ;;  %377 = vmatpush.msra.mxu3 %v348_v14  ;;  %v325_v27 = vld [vmem:[%s844_s3 + $0x30] sm:$0xff]  ;;  %v324_v29 = vld [vmem:[%s844_s3 + $0x28] sm:$0xff]  ;;  %v323_v31 = vld [vmem:[%s844_s3 + $0x20] sm:$0xff] }
  0x1d   : > { %v341_v28 = vld [vmem:[%s844_s3 + $0xb0] sm:$0xff]  ;;  %v340_v30 = vld [vmem:[%s844_s3 + $0xa8] sm:$0xff]  ;;  %v339_v32 = vld [vmem:[%s844_s3 + $0xa0] sm:$0xff]  ;;  %p552_p13 = pneg %p551_p12 }
  0x1e   : > { %358 = vmatpush.msra.mxu2 %v331_v15  ;;  %378 = vmatpush.msra.mxu3 %v347_v16  ;;  %v322_v33 = vld [vmem:[%s844_s3 + $0x18] sm:$0xff]  ;;  %v229_v35 = vld [vmem:[%s843_s2] sm:$0x3]  ;;  %v321_v36 = vld [vmem:[%s844_s3 + $0x10] sm:$0xff] }
  0x1f   : > { %v338_v34 = vld [vmem:[%s844_s3 + $0x98] sm:$0xff]  ;;  %v337_v37 = vld [vmem:[%s844_s3 + $0x90] sm:$0xff]  ;;  %v320_v38 = vld [vmem:[%s844_s3 + $0x8] sm:$0xff]  ;;  %v231_v40 = vperm.slane %v229_v35, 0  ;;  %v232_v41 = vperm.slane %v229_v35, 1  ;;  %p557_p3 = pnand %p556_p2, %p552_p13 }
  0x20   : > { %359 = vmatpush.msra.mxu2 %v330_v17  ;;  %379 = vmatpush.msra.mxu3 %v346_v18  ;;  %v336_v39 = vld [vmem:[%s844_s3 + $0x88] sm:$0xff]  ;;  %v319_v42 = vld [vmem:[%s844_s3] sm:$0xff] }
  0x21   : > { %v335_v43 = vld [vmem:[%s844_s3 + $0x80] sm:$0xff] }
  0x22   : > { %360 = vmatpush.msra.mxu2 %v329_v19  ;;  %380 = vmatpush.msra.mxu3 %v345_v20  ;;  %v524_v12 = vld [vmem:[%s845_s4] ss:$0 sm:$0xff] }
  0x24   : > { %361 = vmatpush.msra.mxu2 %v328_v21  ;;  %381 = vmatpush.msra.mxu3 %v344_v22 }
  0x26   : > { %362 = vmatpush.msra.mxu2 %v327_v23  ;;  %382 = vmatpush.msra.mxu3 %v343_v24 }
  0x28   : > { %363 = vmatpush.msra.mxu2 %v326_v25  ;;  %383 = vmatpush.msra.mxu3 %v342_v26 }
  0x2a   : > { %364 = vmatpush.msra.mxu2 %v325_v27  ;;  %384 = vmatpush.msra.mxu3 %v341_v28 }
  0x2c   : > { %365 = vmatpush.msra.mxu2 %v324_v29  ;;  %385 = vmatpush.msra.mxu3 %v340_v30 }
  0x2e   : > { %366 = vmatpush.msra.mxu2 %v323_v31  ;;  %386 = vmatpush.msra.mxu3 %v339_v32 }
  0x30   : > { %367 = vmatpush.msra.mxu2 %v322_v33  ;;  %387 = vmatpush.msra.mxu3 %v338_v34 }
  0x32   : > { %368 = vmatpush.msra.mxu2 %v321_v36  ;;  %388 = vmatpush.msra.mxu3 %v337_v37 }
  0x34   : > { %369 = vmatpush.msra.mxu2 %v320_v38  ;;  %389 = vmatpush.msra.mxu3 %v336_v39 }
  0x36   : > { %370 = vmatpush.msra.mxu2 %v319_v42  ;;  %390 = vmatpush.msra.mxu3 %v335_v43 }
  0x98   : > { %v256_v44 = vpop.f32.mrf.mxu0  ;;  %v276_v45 = vpop.f32.mrf.mxu1 }
  0x99   : > { %v257_v46 = vadd.f32 %v256_v44, %v231_v40  ;;  %v277_v47 = vadd.f32 %v276_v45, %v232_v41 }
  0x9b   : > { %v479_v48 = vmul.f32 -1.442695, %v257_v46  ;;  %v480_v49 = vmul.f32 -1.442695, %v277_v47 }
  0x9d   : > { %525 = vpow2.f32 %v479_v48 }
  0x9e   : > { %527 = vpow2.f32 %v480_v49 }
  0xa3   : > { %v526_v50 = vpop.eup %525 }
  0xa4   : > { %v528_v51 = vpop.eup %527  ;;  %v285_v52 = vadd.f32 1.0, %v526_v50 }
  0xa5   : > { %v286_v53 = vadd.f32 1.0, %v528_v51 }
  0xa6   : > { %529 = vrcp.f32 %v285_v52  ;;  %v298_v59 = vand.u32 2147483648, %v285_v52  ;;  %v296_v62 = vand.u32 2147483647, %v285_v52  ;;  %vm292_vm3 = vweird.f32 %v285_v52 }
  0xa7   : > { %531 = vrcp.f32 %v286_v53  ;;  %v313_v63 = vand.u32 2147483648, %v286_v53  ;;  %v311_v1 = vand.u32 2147483647, %v286_v53  ;;  %vm307_vm5 = vweird.f32 %v286_v53 }
  0xa8   : > { %v299_v3 = vor.u32 1.1754944e-38, %v298_v59  ;;  %vm297_vm6 = vcmp.eq.f32.partialorder %v296_v62, 8.507059e+37 }
  0xa9   : > { %v314_v6 = vor.u32 1.1754944e-38, %v313_v63  ;;  %vm312_vm8 = vcmp.eq.f32.partialorder %v311_v1, 8.507059e+37 }
  0xac   : > { %v530_v54 = vpop.eup %529 }
  0xad   : > { %v532_v55 = vpop.eup %531  ;;  %v288_v56 = vmul.f32 %v530_v54, %v285_v52  ;;  %vm293_vm1 = vweird.f32 %v530_v54 }
  0xae   : > { %v303_v57 = vmul.f32 %v532_v55, %v286_v53  ;;  %vm308_vm2 = vweird.f32 %v532_v55  ;;  %vm294_vm4 = vmor %vm292_vm3, %vm293_vm1 }
  0xaf   : > { %v289_v58 = vsub.f32 1.0, %v288_v56  ;;  %vm309_vm7 = vmor %vm307_vm5, %vm308_vm2 }
  0xb0   : > { %v304_v60 = vsub.f32 1.0, %v303_v57 }
  0xb1   : > { %v290_v61 = vmul.f32 %v530_v54, %v289_v58 }
  0xb2   : > { %v305_v0 = vmul.f32 %v532_v55, %v304_v60 }
  0xb3   : > { %v291_v2 = vadd.f32 %v530_v54, %v290_v61 }
  0xb4   : > { %v306_v4 = vadd.f32 %v532_v55, %v305_v0 }
  0xb5   : > { %v295_v5 = vsel %vm294_vm4, %v530_v54, %v291_v2 }
  0xb6   : > { %v300_v7 = vsel %vm297_vm6, %v299_v3, %v295_v5  ;;  %v310_v8 = vsel %vm309_vm7, %v532_v55, %v306_v4 }
  0xb7   : > { %v317_v9 = vmul.f32 %v300_v7, %v257_v46  ;;  %v315_v10 = vsel %vm312_vm8, %v314_v6, %v310_v8 }
  0xb8   : > { %v318_v11 = vmul.f32 %v315_v10, %v277_v47 }
  0xb9   : > { %371 = vmatmul.f32.vlgmr.msra.gmra.mxu2 %v317_v9 }
  0xba   : > { %391 = vmatmul.f32.vlgmr.msra.gmra.mxu3 %v318_v11 }
 0x13c   : > { %v372_v13 = vpop.f32.mrf.mxu2 }
 0x13d   : > { %v373_v14 = vadd.f32 %v524_v12, %v372_v13  ;;  %v392_v15 = vpop.f32.mrf.mxu3 }
 0x13f   : > { %v393_v16 = vadd.f32 %v392_v15, %v373_v14 }
 0x141   : > { %395 = vst.msk [vmem:[%s215_s26] sm:$0xff] %vm235_vm0, %v393_v16 }
 0x142   : > { %560 = shalt.err (!%p557_p3)
}
 0x143   : > { %485 = dma.vmem_to_hbm [thread:$0]  (%p665_p5), %s410_s30, 128, %s412_s6, %s397_s22  }
 0x144 PF: > { %p491_p4 = scmp.ge.s32.totalorder %s595_s21, 2  ;;  %s423_s12 = sand.u32 1, %s583_s18  }
 0x145   : > { %s424_s15 = scalar_lea.sflag [#allocation3], %s423_s12 }
 0x146   : > { %p488_p7 = pnand %p491_p4, %p669_p6 }
 0x148   : > { %p489_p8 = pneg %p488_p7 }
 0x14a   : > { %578 = dma.done.wait (%p489_p8), %s424_s15, 128  }
 0x14b   : > { %580 = vsyncadd (%p489_p8), %s424_s15, 4294967168  ;;  %p15_p9 = scmp.ge.s32.totalorder %s652_s24, 4   ;;  %s849_s18 = smov %s587_s19 }
 0x14c   : > { %s850_s19 = smov %s591_s20  ;;  %s851_s20 = smov %s663_s27 }
 0x14d   : > { %s852_s21 = smov %s652_s24  ;;  %17 = sbr.rel (!%p15_p9) target bundleno = 3 (0x3), region = 75 }
 0x152   :  { %430 = vsyncpa [#allocation3], 1 }
 0x153   :  { %432 = vsyncpa [#allocation3 + $0x1], 1 }

</bundles_post_ra>
